<compile_context>
chip_gen: v6e
topology: v6e:2x2x1
jax: 0.10.0
libtpu: 0.0.40
codegen_flags: <defaults>
</compile_context>

<pallas_src>
import functools

import jax
import jax.numpy as jnp
from jax.experimental import pallas as pl
from jax.experimental.pallas import tpu as pltpu

_BN_EPS = 1e-5
_VMEM_LIMIT = 48 * 1024 * 1024   # safe on all generations (v7x physical = 64 MiB)


def _round_up(x, m):
    return (x + m - 1) // m * m


# ---------------------------------------------------------------------------
# Phase 1: per-feature batch statistics (sum, sum of squares) of h1 = fc1(x).
# Stats output block stays resident across the whole grid (accumulator).
# ---------------------------------------------------------------------------
def _stats_kernel(s_ref, a_ref, w1s_ref, w1a_ref, b1_ref, stats_ref,
                  *, tile_b, batch):
    t = pl.program_id(0)

    @pl.when(t == 0)
    def _():
        stats_ref[...] = jnp.zeros_like(stats_ref)

    s_bf = s_ref[...].astype(jnp.bfloat16)
    a_bf = a_ref[...].astype(jnp.bfloat16)
    h1 = (jnp.dot(s_bf, w1s_ref[...], preferred_element_type=jnp.float32)
          + jnp.dot(a_bf, w1a_ref[...], preferred_element_type=jnp.float32)
          + b1_ref[...])

    # Mask rows past the true batch size (batch was zero-padded to a multiple
    # of tile_b in the wrapper); zeroed rows drop out of both sums.
    row = t * tile_b + jax.lax.broadcasted_iota(jnp.int32, h1.shape, 0)
    h1 = jnp.where(row < batch, h1, 0.0)

    stats_ref[0:1, :] += jnp.sum(h1, axis=0, keepdims=True)
    stats_ref[1:2, :] += jnp.sum(h1 * h1, axis=0, keepdims=True)


# ---------------------------------------------------------------------------
# Phase 2: recompute fc1, apply folded-bn affine, relu, fc2, relu, fc3.
# Batch-tile axis is "parallel" (megacore-shardable on v7x).
# ---------------------------------------------------------------------------
def _fwd_kernel(s_ref, a_ref, w1s_ref, w1a_ref, b1_ref, scale_ref, shift_ref,
                w2_ref, b2_ref, w3_ref, b3_ref, o_ref):
    s_bf = s_ref[...].astype(jnp.bfloat16)
    a_bf = a_ref[...].astype(jnp.bfloat16)
    # fc1 with the state/action concat folded into two matmuls (bf16 MXU
    # operands, f32 accumulation).
    # TODO(synk): optionally fuse into a single [tile_b, 32] @ [32, 512] matmul
    # by staging a concatenated LHS in a VMEM scratch.
    h1 = (jnp.dot(s_bf, w1s_ref[...], preferred_element_type=jnp.float32)
          + jnp.dot(a_bf, w1a_ref[...], preferred_element_type=jnp.float32)
          + b1_ref[...])

    # bn1 folded into a per-feature affine (scale/shift from phase-1 stats).
    a1 = jnp.maximum(h1 * scale_ref[...] + shift_ref[...], 0.0)

    # fc2 + relu (bf16 MXU operands, f32 accumulation).
    h2 = jnp.dot(a1.astype(jnp.bfloat16), w2_ref[...],
                 preferred_element_type=jnp.float32) + b2_ref[...]
    a2 = jnp.maximum(h2, 0.0)

    # fc3 (output width 1): VPU broadcast-multiply + lane reduce.
    o_ref[...] = jnp.sum(a2 * w3_ref[...], axis=-1, keepdims=True) + b3_ref[...]


def _pick_tile_b(batch, target=256):
    # 256-row tiles: full systolic occupancy on v6e/v7x (2x256^2 MXU), also a
    # multiple of 128 for v5e; minimum 8 sublanes.  Small batches -> one tile.
    if batch <= target:
        return _round_up(batch, 8)
    return target


def critic_forward(state, action, params, *, tile_b=None):
    """state: (B, state_size), action: (B, action_size) -> (B, 1)."""
    B = state.shape[0]
    assert action.shape[0] == B
    assert B >= 2, "BatchNorm1d in training mode needs batch size >= 2"

    state = state.astype(jnp.float32)
    action = action.astype(jnp.float32)

    S = state.shape[1]
    A = action.shape[1]
    f1p = params["w1_s"].shape[1]
    f2p = params["w2"].shape[1]

    if tile_b is None:
        tile_b = _pick_tile_b(B)
    b_pad = _round_up(B, tile_b)
    nt = b_pad // tile_b
    if b_pad != B:
        state = jnp.pad(state, ((0, b_pad - B), (0, 0)))
        action = jnp.pad(action, ((0, b_pad - B), (0, 0)))

    def resident(arr):
        # Constant index map across the batch-tile axis -> fetched once,
        # stays resident in VMEM for the whole grid.
        nd = arr.ndim
        return pl.BlockSpec(arr.shape, lambda t, _nd=nd: (0,) * _nd)

    s_spec = pl.BlockSpec((tile_b, S), lambda t: (t, 0))
    a_spec = pl.BlockSpec((tile_b, A), lambda t: (t, 0))

    # ---------------- Phase 1: batch statistics of h1 ----------------------
    stats_inputs = (state, action, params["w1_s"], params["w1_a"], params["b1"])
    stats_flops = 2 * b_pad * (S + A) * f1p + 4 * b_pad * f1p
    stats_bytes = sum(int(a.size) * a.dtype.itemsize for a in stats_inputs) \
        + 2 * f1p * 4
    stats = pl.pallas_call(
        functools.partial(_stats_kernel, tile_b=tile_b, batch=B),
        out_shape=jax.ShapeDtypeStruct((2, f1p), jnp.float32),
        grid_spec=pltpu.PrefetchScalarGridSpec(
            num_scalar_prefetch=0,
            grid=(nt,),
            in_specs=[s_spec, a_spec,
                      resident(params["w1_s"]), resident(params["w1_a"]),
                      resident(params["b1"])],
            out_specs=pl.BlockSpec((2, f1p), lambda t: (0, 0)),
        ),
        compiler_params=pltpu.CompilerParams(
            dimension_semantics=("arbitrary",),   # accumulator across tiles
            vmem_limit_bytes=_VMEM_LIMIT),
        cost_estimate=pl.CostEstimate(flops=int(stats_flops), transcendentals=0,
                                      bytes_accessed=int(stats_bytes)),
    )(*stats_inputs)

    # Tiny per-feature epilogue (f1p elements): fold bn1 into an affine.
    # Padded channels: sum = sumsq = 0 -> var = 0 -> scale = gamma(=0)*rsqrt(eps)
    # = 0, shift = 0, so they stay exactly zero downstream (invariant relied on
    # by init_critic_params; do not set padded gamma entries to 1).
    mean = stats[0:1, :] / B
    var = jnp.maximum(stats[1:2, :] / B - mean * mean, 0.0)
    inv_std = jax.lax.rsqrt(var + _BN_EPS)
    scale = params["gamma1"] * inv_std                 # (1, f1p)
    shift = params["beta1"] - mean * scale             # (1, f1p)

    # ---------------- Phase 2: normalize + fc2 + relu + fc3 ----------------
    fwd_inputs = (state, action,
                  params["w1_s"], params["w1_a"], params["b1"], scale, shift,
                  params["w2"], params["b2"], params["w3"], params["b3"])
    fwd_flops = 2 * b_pad * ((S + A) * f1p + f1p * f2p + f2p)
    fwd_bytes = sum(int(a.size) * a.dtype.itemsize for a in fwd_inputs) + b_pad * 4
    out = pl.pallas_call(
        _fwd_kernel,
        out_shape=jax.ShapeDtypeStruct((b_pad, 1), jnp.float32),
        grid_spec=pltpu.PrefetchScalarGridSpec(
            num_scalar_prefetch=0,
            grid=(nt,),
            in_specs=[s_spec, a_spec] + [resident(a) for a in fwd_inputs[2:]],
            out_specs=pl.BlockSpec((tile_b, 1), lambda t: (t, 0)),
        ),
        compiler_params=pltpu.CompilerParams(
            dimension_semantics=("parallel",),    # megacore-shardable on v7x
            vmem_limit_bytes=_VMEM_LIMIT),
        cost_estimate=pl.CostEstimate(flops=int(fwd_flops), transcendentals=0,
                                      bytes_accessed=int(fwd_bytes)),
    )(*fwd_inputs)

    return out[:B]


def init_critic_params(key, state_size, action_size, fc1_units=400, fc2_units=300):
    """Xavier-uniform weights (as in the PyTorch __init__), stored transposed
    as [in, out], split into state/action halves, zero-padded so feature dims
    are multiples of 128, and cast to bf16 for the MXU.  Padded channels carry
    exactly 0 through bn1 (gamma=beta=0 there), relu, fc2 and fc3."""
    f1p = _round_up(fc1_units, 128)   # 400 -> 512
    f2p = _round_up(fc2_units, 128)   # 300 -> 384
    in1 = state_size + action_size

    k1, k2, k3, kb1, kb2, kb3 = jax.random.split(key, 6)

    def xavier(k, fan_in, fan_out):
        limit = jnp.sqrt(6.0 / (fan_in + fan_out))
        return jax.random.uniform(k, (fan_in, fan_out), jnp.float32, -limit, limit)

    def linear_bias(k, fan_in, fan_out):
        bound = 1.0 / jnp.sqrt(jnp.float32(fan_in))
        return jax.random.uniform(k, (1, fan_out), jnp.float32, -bound, bound)

    def pad_cols(x, new_cols):
        return jnp.pad(x, ((0, 0), (0, new_cols - x.shape[1])))

    def pad_rows(x, new_rows):
        return jnp.pad(x, ((0, new_rows - x.shape[0]), (0, 0)))

    w1 = pad_cols(xavier(k1, in1, fc1_units), f1p)                       # [in1, f1p]
    w2 = pad_cols(pad_rows(xavier(k2, fc1_units, fc2_units), f1p), f2p)  # [f1p, f2p]
    w3 = pad_rows(xavier(k3, fc2_units, 1), f2p)                         # [f2p, 1]

    return {
        "w1_s": w1[:state_size].astype(jnp.bfloat16),      # [S, f1p]
        "w1_a": w1[state_size:].astype(jnp.bfloat16),      # [A, f1p]
        "b1": pad_cols(linear_bias(kb1, in1, fc1_units), f1p),
        "gamma1": pad_cols(jnp.ones((1, fc1_units), jnp.float32), f1p),
        "beta1": jnp.zeros((1, f1p), jnp.float32),
        "w2": w2.astype(jnp.bfloat16),                     # [f1p, f2p]
        "b2": pad_cols(linear_bias(kb2, fc1_units, fc2_units), f2p),
        "w3": w3.T.astype(jnp.float32),                    # [1, f2p] row (VPU reduce)
        "b3": linear_bias(kb3, fc2_units, 1),              # [1, 1]
    }


if __name__ == "__main__":
    # Small, forward-consistent shapes.  NOTE: at tiny B the kernel is
    # weight-DMA/latency bound — benchmark at realistic B before drawing
    # MXU conclusions.
    batch, state_size, action_size = 8, 16, 8
    fc1_units, fc2_units = 400, 300

    key = jax.random.PRNGKey(0)
    kp, ks, ka = jax.random.split(key, 3)

    params = init_critic_params(kp, state_size, action_size, fc1_units, fc2_units)
    state = jax.random.normal(ks, (batch, state_size), jnp.float32)
    action = jax.random.normal(ka, (batch, action_size), jnp.float32)

    fwd = jax.jit(critic_forward)
    q = fwd(state, action, params)
    q = jax.block_until_ready(q)
    assert q.shape == (batch, 1), q.shape

    # Pure-JAX reference of the same math (same bf16 operand rounding).
    def ref_forward(s, a, p):
        s = s.astype(jnp.bfloat16).astype(jnp.float32)
        a = a.astype(jnp.bfloat16).astype(jnp.float32)
        h1 = (s @ p["w1_s"].astype(jnp.float32)
              + a @ p["w1_a"].astype(jnp.float32) + p["b1"])
        mu = h1.mean(0, keepdims=True)
        var = ((h1 - mu) ** 2).mean(0, keepdims=True)
        h1n = (h1 - mu) / jnp.sqrt(var + _BN_EPS) * p["gamma1"] + p["beta1"]
        a1 = jnp.maximum(h1n, 0.0).astype(jnp.bfloat16).astype(jnp.float32)
        a2 = jnp.maximum(a1 @ p["w2"].astype(jnp.float32) + p["b2"], 0.0)
        return (a2 * p["w3"]).sum(-1, keepdims=True) + p["b3"]

    ref = ref_forward(state, action, params)
    assert jnp.allclose(q, ref, atol=2e-3, rtol=2e-3), (q, ref)

    print("KERNEL_OK")
</pallas_src>

<mosaic_0001>
module attributes {stable_mosaic.version = 11 : i64} {
  func.func @_fwd_kernel(%arg0: i32, %arg1: memref<8x16xf32, #tpu.memory_space<vmem>>, %arg2: memref<8x8xf32, #tpu.memory_space<vmem>>, %arg3: memref<16x512xbf16, #tpu.memory_space<vmem>>, %arg4: memref<8x512xbf16, #tpu.memory_space<vmem>>, %arg5: memref<1x512xf32, #tpu.memory_space<vmem>>, %arg6: memref<1x512xf32, #tpu.memory_space<vmem>>, %arg7: memref<1x512xf32, #tpu.memory_space<vmem>>, %arg8: memref<512x384xbf16, #tpu.memory_space<vmem>>, %arg9: memref<1x384xf32, #tpu.memory_space<vmem>>, %arg10: memref<1x384xf32, #tpu.memory_space<vmem>>, %arg11: memref<1x1xf32, #tpu.memory_space<vmem>>, %arg12: memref<8x1xf32, #tpu.memory_space<vmem>>) attributes {dimension_semantics = [#tpu.dimension_semantics<parallel>], iteration_bounds = array<i64: 1>, scalar_prefetch = 0 : i64, scratch_operands = 0 : i64, tpu.core_type = #tpu.core_type<tc>, window_params = [{transform_indices = @transform_0, window_bounds = array<i64: 8, 16>}, {transform_indices = @transform_1, window_bounds = array<i64: 8, 8>}, {pipeline_mode = #tpu.pipeline_mode<synchronous>, transform_indices = @transform_2, window_bounds = array<i64: 16, 512>}, {pipeline_mode = #tpu.pipeline_mode<synchronous>, transform_indices = @transform_3, window_bounds = array<i64: 8, 512>}, {pipeline_mode = #tpu.pipeline_mode<synchronous>, transform_indices = @transform_4, window_bounds = array<i64: 1, 512>}, {pipeline_mode = #tpu.pipeline_mode<synchronous>, transform_indices = @transform_5, window_bounds = array<i64: 1, 512>}, {pipeline_mode = #tpu.pipeline_mode<synchronous>, transform_indices = @transform_6, window_bounds = array<i64: 1, 512>}, {pipeline_mode = #tpu.pipeline_mode<synchronous>, transform_indices = @transform_7, window_bounds = array<i64: 512, 384>}, {pipeline_mode = #tpu.pipeline_mode<synchronous>, transform_indices = @transform_8, window_bounds = array<i64: 1, 384>}, {pipeline_mode = #tpu.pipeline_mode<synchronous>, transform_indices = @transform_9, window_bounds = array<i64: 1, 384>}, {pipeline_mode = #tpu.pipeline_mode<synchronous>, transform_indices = @transform_10, window_bounds = array<i64: 1, 1>}, {transform_indices = @transform_11, window_bounds = array<i64: 8, 1>}]} {
    %c0 = arith.constant 0 : index
    %c0_0 = arith.constant 0 : index
    %0 = vector.load %arg1[%c0, %c0_0] : memref<8x16xf32, #tpu.memory_space<vmem>>, vector<8x16xf32>
    %1 = arith.truncf %0 : vector<8x16xf32> to vector<8x16xbf16>
    %c0_1 = arith.constant 0 : index
    %c0_2 = arith.constant 0 : index
    %2 = vector.load %arg2[%c0_1, %c0_2] : memref<8x8xf32, #tpu.memory_space<vmem>>, vector<8x8xf32>
    %3 = arith.truncf %2 : vector<8x8xf32> to vector<8x8xbf16>
    %c0_3 = arith.constant 0 : index
    %c0_4 = arith.constant 0 : index
    %4 = vector.load %arg3[%c0_3, %c0_4] : memref<16x512xbf16, #tpu.memory_space<vmem>>, vector<16x512xbf16>
    %cst = arith.constant dense<0.000000e+00> : vector<8x512xf32>
    %5 = tpu.matmul %1, %4, %cst {dimension_numbers = #tpu.dot_dimension_numbers<[1], [0], [0], [1], [0, 0, 1, 1], [], []>} : vector<8x16xbf16>, vector<16x512xbf16>, vector<8x512xf32> -> vector<8x512xf32>
    %c0_5 = arith.constant 0 : index
    %c0_6 = arith.constant 0 : index
    %6 = vector.load %arg4[%c0_5, %c0_6] : memref<8x512xbf16, #tpu.memory_space<vmem>>, vector<8x512xbf16>
    %cst_7 = arith.constant dense<0.000000e+00> : vector<8x512xf32>
    %7 = tpu.matmul %3, %6, %cst_7 {dimension_numbers = #tpu.dot_dimension_numbers<[1], [0], [0], [1], [0, 0, 1, 1], [], []>} : vector<8x8xbf16>, vector<8x512xbf16>, vector<8x512xf32> -> vector<8x512xf32>
    %8 = arith.addf %5, %7 : vector<8x512xf32>
    %c0_8 = arith.constant 0 : index
    %c0_9 = arith.constant 0 : index
    %9 = vector.load %arg5[%c0_8, %c0_9] : memref<1x512xf32, #tpu.memory_space<vmem>>, vector<1x512xf32>
    %10 = vector.broadcast %9 : vector<1x512xf32> to vector<8x512xf32>
    %11 = arith.addf %8, %10 : vector<8x512xf32>
    %c0_10 = arith.constant 0 : index
    %c0_11 = arith.constant 0 : index
    %12 = vector.load %arg6[%c0_10, %c0_11] : memref<1x512xf32, #tpu.memory_space<vmem>>, vector<1x512xf32>
    %13 = vector.broadcast %12 : vector<1x512xf32> to vector<8x512xf32>
    %14 = arith.mulf %11, %13 : vector<8x512xf32>
    %c0_12 = arith.constant 0 : index
    %c0_13 = arith.constant 0 : index
    %15 = vector.load %arg7[%c0_12, %c0_13] : memref<1x512xf32, #tpu.memory_space<vmem>>, vector<1x512xf32>
    %16 = vector.broadcast %15 : vector<1x512xf32> to vector<8x512xf32>
    %17 = arith.addf %14, %16 : vector<8x512xf32>
    %cst_14 = arith.constant 0.000000e+00 : f32
    %18 = vector.broadcast %cst_14 : f32 to vector<8x512xf32>
    %19 = arith.maximumf %17, %18 : vector<8x512xf32>
    %20 = arith.truncf %19 : vector<8x512xf32> to vector<8x512xbf16>
    %c0_15 = arith.constant 0 : index
    %c0_16 = arith.constant 0 : index
    %21 = vector.load %arg8[%c0_15, %c0_16] : memref<512x384xbf16, #tpu.memory_space<vmem>>, vector<512x384xbf16>
    %cst_17 = arith.constant dense<0.000000e+00> : vector<8x384xf32>
    %22 = tpu.matmul %20, %21, %cst_17 {dimension_numbers = #tpu.dot_dimension_numbers<[1], [0], [0], [1], [0, 0, 1, 1], [], []>} : vector<8x512xbf16>, vector<512x384xbf16>, vector<8x384xf32> -> vector<8x384xf32>
    %c0_18 = arith.constant 0 : index
    %c0_19 = arith.constant 0 : index
    %23 = vector.load %arg9[%c0_18, %c0_19] : memref<1x384xf32, #tpu.memory_space<vmem>>, vector<1x384xf32>
    %24 = vector.broadcast %23 : vector<1x384xf32> to vector<8x384xf32>
    %25 = arith.addf %22, %24 : vector<8x384xf32>
    %cst_20 = arith.constant 0.000000e+00 : f32
    %26 = vector.broadcast %cst_20 : f32 to vector<8x384xf32>
    %27 = arith.maximumf %25, %26 : vector<8x384xf32>
    %c0_21 = arith.constant 0 : index
    %c0_22 = arith.constant 0 : index
    %28 = vector.load %arg10[%c0_21, %c0_22] : memref<1x384xf32, #tpu.memory_space<vmem>>, vector<1x384xf32>
    %29 = vector.broadcast %28 : vector<1x384xf32> to vector<8x384xf32>
    %30 = arith.mulf %27, %29 : vector<8x384xf32>
    %cst_23 = arith.constant dense<0.000000e+00> : vector<8xf32>
    %31 = vector.multi_reduction <add>, %30, %cst_23 [1] : vector<8x384xf32> to vector<8xf32>
    %32 = vector.shape_cast %31 : vector<8xf32> to vector<8x1xf32>
    %c0_24 = arith.constant 0 : index
    %c0_25 = arith.constant 0 : index
    %33 = vector.load %arg11[%c0_24, %c0_25] : memref<1x1xf32, #tpu.memory_space<vmem>>, vector<1x1xf32>
    %34 = vector.broadcast %33 : vector<1x1xf32> to vector<8x1xf32>
    %35 = arith.addf %32, %34 : vector<8x1xf32>
    %c0_26 = arith.constant 0 : index
    %c0_27 = arith.constant 0 : index
    %36 = vector.load %arg12[%c0_26, %c0_27] : memref<8x1xf32, #tpu.memory_space<vmem>>, vector<8x1xf32>
    tpu.vector_store %arg12[%c0_26, %c0_27], %35 {strides = array<i32>} : memref<8x1xf32, #tpu.memory_space<vmem>>, vector<8x1xf32>,
    return
  }
  func.func @transform_0(%arg0: i32) -> (i32, i32) {
    %c0_i32 = arith.constant 0 : i32
    %c0_i32_0 = arith.constant 0 : i32
    return %arg0, %c0_i32 : i32, i32
  }
  func.func @transform_1(%arg0: i32) -> (i32, i32) {
    %c0_i32 = arith.constant 0 : i32
    %c0_i32_0 = arith.constant 0 : i32
    return %arg0, %c0_i32 : i32, i32
  }
  func.func @transform_2(%arg0: i32) -> (i32, i32) {
    %c0_i32 = arith.constant 0 : i32
    %c0_i32_0 = arith.constant 0 : i32
    %c0_i32_1 = arith.constant 0 : i32
    return %c0_i32, %c0_i32_0 : i32, i32
  }
  func.func @transform_3(%arg0: i32) -> (i32, i32) {
    %c0_i32 = arith.constant 0 : i32
    %c0_i32_0 = arith.constant 0 : i32
    %c0_i32_1 = arith.constant 0 : i32
    return %c0_i32, %c0_i32_0 : i32, i32
  }
  func.func @transform_4(%arg0: i32) -> (i32, i32) {
    %c0_i32 = arith.constant 0 : i32
    %c0_i32_0 = arith.constant 0 : i32
    %c0_i32_1 = arith.constant 0 : i32
    return %c0_i32, %c0_i32_0 : i32, i32
  }
  func.func @transform_5(%arg0: i32) -> (i32, i32) {
    %c0_i32 = arith.constant 0 : i32
    %c0_i32_0 = arith.constant 0 : i32
    %c0_i32_1 = arith.constant 0 : i32
    return %c0_i32, %c0_i32_0 : i32, i32
  }
  func.func @transform_6(%arg0: i32) -> (i32, i32) {
    %c0_i32 = arith.constant 0 : i32
    %c0_i32_0 = arith.constant 0 : i32
    %c0_i32_1 = arith.constant 0 : i32
    return %c0_i32, %c0_i32_0 : i32, i32
  }
  func.func @transform_7(%arg0: i32) -> (i32, i32) {
    %c0_i32 = arith.constant 0 : i32
    %c0_i32_0 = arith.constant 0 : i32
    %c0_i32_1 = arith.constant 0 : i32
    return %c0_i32, %c0_i32_0 : i32, i32
  }
  func.func @transform_8(%arg0: i32) -> (i32, i32) {
    %c0_i32 = arith.constant 0 : i32
    %c0_i32_0 = arith.constant 0 : i32
    %c0_i32_1 = arith.constant 0 : i32
    return %c0_i32, %c0_i32_0 : i32, i32
  }
  func.func @transform_9(%arg0: i32) -> (i32, i32) {
    %c0_i32 = arith.constant 0 : i32
    %c0_i32_0 = arith.constant 0 : i32
    %c0_i32_1 = arith.constant 0 : i32
    return %c0_i32, %c0_i32_0 : i32, i32
  }
  func.func @transform_10(%arg0: i32) -> (i32, i32) {
    %c0_i32 = arith.constant 0 : i32
    %c0_i32_0 = arith.constant 0 : i32
    %c0_i32_1 = arith.constant 0 : i32
    return %c0_i32, %c0_i32_0 : i32, i32
  }
  func.func @transform_11(%arg0: i32) -> (i32, i32) {
    %c0_i32 = arith.constant 0 : i32
    %c0_i32_0 = arith.constant 0 : i32
    return %arg0, %c0_i32 : i32, i32
  }
}

module attributes {stable_mosaic.version = 11 : i64} {
  func.func @_stats_kernel(%arg0: i32, %arg1: memref<8x16xf32, #tpu.memory_space<vmem>>, %arg2: memref<8x8xf32, #tpu.memory_space<vmem>>, %arg3: memref<16x512xbf16, #tpu.memory_space<vmem>>, %arg4: memref<8x512xbf16, #tpu.memory_space<vmem>>, %arg5: memref<1x512xf32, #tpu.memory_space<vmem>>, %arg6: memref<2x512xf32, #tpu.memory_space<vmem>>) attributes {dimension_semantics = [#tpu.dimension_semantics<arbitrary>], iteration_bounds = array<i64: 1>, scalar_prefetch = 0 : i64, scratch_operands = 0 : i64, tpu.core_type = #tpu.core_type<tc>, window_params = [{transform_indices = @transform_0, window_bounds = array<i64: 8, 16>}, {transform_indices = @transform_1, window_bounds = array<i64: 8, 8>}, {pipeline_mode = #tpu.pipeline_mode<synchronous>, transform_indices = @transform_2, window_bounds = array<i64: 16, 512>}, {pipeline_mode = #tpu.pipeline_mode<synchronous>, transform_indices = @transform_3, window_bounds = array<i64: 8, 512>}, {pipeline_mode = #tpu.pipeline_mode<synchronous>, transform_indices = @transform_4, window_bounds = array<i64: 1, 512>}, {pipeline_mode = #tpu.pipeline_mode<synchronous>, transform_indices = @transform_5, window_bounds = array<i64: 2, 512>}]} {
    %c0_i32 = arith.constant 0 : i32
    %0 = arith.cmpi eq, %arg0, %c0_i32 : i32
    %1 = arith.extui %0 : i1 to i32
    %c0_i32_0 = arith.constant 0 : i32
    %2 = arith.cmpi ne, %1, %c0_i32_0 : i32
    scf.if %2 {
      %cst_22 = arith.constant 0.000000e+00 : f32
      %34 = vector.broadcast %cst_22 : f32 to vector<2x512xf32>
      %c0_23 = arith.constant 0 : index
      %c0_24 = arith.constant 0 : index
      %35 = vector.load %arg6[%c0_23, %c0_24] : memref<2x512xf32, #tpu.memory_space<vmem>>, vector<2x512xf32>
      tpu.vector_store %arg6[%c0_23, %c0_24], %34 {strides = array<i32>} : memref<2x512xf32, #tpu.memory_space<vmem>>, vector<2x512xf32>,
    } else {
    }
    %c0 = arith.constant 0 : index
    %c0_1 = arith.constant 0 : index
    %3 = vector.load %arg1[%c0, %c0_1] : memref<8x16xf32, #tpu.memory_space<vmem>>, vector<8x16xf32>
    %4 = arith.truncf %3 : vector<8x16xf32> to vector<8x16xbf16>
    %c0_2 = arith.constant 0 : index
    %c0_3 = arith.constant 0 : index
    %5 = vector.load %arg2[%c0_2, %c0_3] : memref<8x8xf32, #tpu.memory_space<vmem>>, vector<8x8xf32>
    %6 = arith.truncf %5 : vector<8x8xf32> to vector<8x8xbf16>
    %c0_4 = arith.constant 0 : index
    %c0_5 = arith.constant 0 : index
    %7 = vector.load %arg3[%c0_4, %c0_5] : memref<16x512xbf16, #tpu.memory_space<vmem>>, vector<16x512xbf16>
    %cst = arith.constant dense<0.000000e+00> : vector<8x512xf32>
    %8 = tpu.matmul %4, %7, %cst {dimension_numbers = #tpu.dot_dimension_numbers<[1], [0], [0], [1], [0, 0, 1, 1], [], []>} : vector<8x16xbf16>, vector<16x512xbf16>, vector<8x512xf32> -> vector<8x512xf32>
    %c0_6 = arith.constant 0 : index
    %c0_7 = arith.constant 0 : index
    %9 = vector.load %arg4[%c0_6, %c0_7] : memref<8x512xbf16, #tpu.memory_space<vmem>>, vector<8x512xbf16>
    %cst_8 = arith.constant dense<0.000000e+00> : vector<8x512xf32>
    %10 = tpu.matmul %6, %9, %cst_8 {dimension_numbers = #tpu.dot_dimension_numbers<[1], [0], [0], [1], [0, 0, 1, 1], [], []>} : vector<8x8xbf16>, vector<8x512xbf16>, vector<8x512xf32> -> vector<8x512xf32>
    %11 = arith.addf %8, %10 : vector<8x512xf32>
    %c0_9 = arith.constant 0 : index
    %c0_10 = arith.constant 0 : index
    %12 = vector.load %arg5[%c0_9, %c0_10] : memref<1x512xf32, #tpu.memory_space<vmem>>, vector<1x512xf32>
    %13 = vector.broadcast %12 : vector<1x512xf32> to vector<8x512xf32>
    %14 = arith.addf %11, %13 : vector<8x512xf32>
    %c8_i32 = arith.constant 8 : i32
    %15 = arith.muli %arg0, %c8_i32 : i32
    %16 = tpu.iota {dimensions = array<i32: 0>} : vector<8x512xi32>
    %17 = vector.broadcast %15 : i32 to vector<8x512xi32>
    %18 = arith.addi %17, %16 : vector<8x512xi32>
    %c8_i32_11 = arith.constant 8 : i32
    %19 = vector.broadcast %c8_i32_11 : i32 to vector<8x512xi32>
    %20 = arith.cmpi slt, %18, %19 : vector<8x512xi32>
    %cst_12 = arith.constant 0.000000e+00 : f32
    %21 = vector.broadcast %cst_12 : f32 to vector<8x512xf32>
    %22 = arith.select %20, %14, %21 : vector<8x512xi1>, vector<8x512xf32>
    %c0_13 = arith.constant 0 : index
    %c0_14 = arith.constant 0 : index
    %23 = vector.load %arg6[%c0_13, %c0_14] : memref<2x512xf32, #tpu.memory_space<vmem>>, vector<1x512xf32>
    %cst_15 = arith.constant dense<0.000000e+00> : vector<512xf32>
    %24 = vector.multi_reduction <add>, %22, %cst_15 [0] : vector<8x512xf32> to vector<512xf32>
    %25 = vector.shape_cast %24 : vector<512xf32> to vector<1x512xf32>
    %26 = arith.addf %23, %25 : vector<1x512xf32>
    %c0_16 = arith.constant 0 : index
    %c0_17 = arith.constant 0 : index
    %27 = vector.load %arg6[%c0_16, %c0_17] : memref<2x512xf32, #tpu.memory_space<vmem>>, vector<1x512xf32>
    tpu.vector_store %arg6[%c0_16, %c0_17], %26 {strides = array<i32>} : memref<2x512xf32, #tpu.memory_space<vmem>>, vector<1x512xf32>,
    %c1 = arith.constant 1 : index
    %c0_18 = arith.constant 0 : index
    %28 = vector.load %arg6[%c1, %c0_18] : memref<2x512xf32, #tpu.memory_space<vmem>>, vector<1x512xf32>
    %29 = arith.mulf %22, %22 : vector<8x512xf32>
    %cst_19 = arith.constant dense<0.000000e+00> : vector<512xf32>
    %30 = vector.multi_reduction <add>, %29, %cst_19 [0] : vector<8x512xf32> to vector<512xf32>
    %31 = vector.shape_cast %30 : vector<512xf32> to vector<1x512xf32>
    %32 = arith.addf %28, %31 : vector<1x512xf32>
    %c1_20 = arith.constant 1 : index
    %c0_21 = arith.constant 0 : index
    %33 = vector.load %arg6[%c1_20, %c0_21] : memref<2x512xf32, #tpu.memory_space<vmem>>, vector<1x512xf32>
    tpu.vector_store %arg6[%c1_20, %c0_21], %32 {strides = array<i32>} : memref<2x512xf32, #tpu.memory_space<vmem>>, vector<1x512xf32>,
    return
  }
  func.func @transform_0(%arg0: i32) -> (i32, i32) {
    %c0_i32 = arith.constant 0 : i32
    %c0_i32_0 = arith.constant 0 : i32
    return %arg0, %c0_i32 : i32, i32
  }
  func.func @transform_1(%arg0: i32) -> (i32, i32) {
    %c0_i32 = arith.constant 0 : i32
    %c0_i32_0 = arith.constant 0 : i32
    return %arg0, %c0_i32 : i32, i32
  }
  func.func @transform_2(%arg0: i32) -> (i32, i32) {
    %c0_i32 = arith.constant 0 : i32
    %c0_i32_0 = arith.constant 0 : i32
    %c0_i32_1 = arith.constant 0 : i32
    return %c0_i32, %c0_i32_0 : i32, i32
  }
  func.func @transform_3(%arg0: i32) -> (i32, i32) {
    %c0_i32 = arith.constant 0 : i32
    %c0_i32_0 = arith.constant 0 : i32
    %c0_i32_1 = arith.constant 0 : i32
    return %c0_i32, %c0_i32_0 : i32, i32
  }
  func.func @transform_4(%arg0: i32) -> (i32, i32) {
    %c0_i32 = arith.constant 0 : i32
    %c0_i32_0 = arith.constant 0 : i32
    %c0_i32_1 = arith.constant 0 : i32
    return %c0_i32, %c0_i32_0 : i32, i32
  }
  func.func @transform_5(%arg0: i32) -> (i32, i32) {
    %c0_i32 = arith.constant 0 : i32
    %c0_i32_0 = arith.constant 0 : i32
    %c0_i32_1 = arith.constant 0 : i32
    return %c0_i32, %c0_i32_0 : i32, i32
  }
}

</mosaic_0001>

<bundles_post_ra>
// kernel: critic_forward.2
= control target key start
LH: loop header
LB: loop body
LE: loop exit
PB: predicated region body
PF: predicated region fallthrough
CT: control target
= control target key end

     0   :  { %10 = vsyncpa [#allocation3], 0  ;;  %s626_s0 = inlined_call_operand.vmem [shape: f32[8,16], index: 0, kind: input, shape index: {}]   ;;  %s627_s1 = inlined_call_operand.vmem [shape: f32[8,8], index: 1, kind: input, shape index: {}]   ;;  %s628_s2 = inlined_call_operand.hbm [shape: bf16[16,512], index: 2, kind: input, shape index: {}]   ;;  %s629_s3 = inlined_call_operand.hbm [shape: bf16[8,512], index: 3, kind: input, shape index: {}]   ;;  %s630_s4 = inlined_call_operand.hbm [shape: f32[1,512], index: 4, kind: input, shape index: {}]   ;;  %s631_s5 = inlined_call_operand.vmem [shape: f32[2,512], index: 5, kind: output, shape index: {}]  }
   0x1   :  { %11 = vsyncpa [#allocation5], 0  ;;  %s549_s18 = smov [#allocation4]   ;;  %s550_s20 = smov [#allocation2]  }
   0x2   :  { %s34_s19 = sshll.u32 %s549_s18, 4  ;;  %s21_s21 = sshll.u32 %s550_s20, 4  ;;  %s35_s19 = int_to_ptr.vmem [resolvable:$true] %s34_s19  ;;  %s22_s21 = int_to_ptr.vmem [resolvable:$true] %s21_s21 }
   0x3   :  { %s493_s22 = scalar_lea.vmem %s35_s19, 256  ;;  %p498_p1 = scmp.lt.s32.totalorder %s35_s19, %s35_s19 }
   0x4   :  { %p494_p0 = scmp.ne.s32.totalorder %s35_s19, %s493_s22  ;;  %p499_p2 = scmp.lt.s32.totalorder %s493_s22, %s493_s22 }
   0x6   :  { %p500_p3 = por %p499_p2, %p498_p1 }
   0x8   :  { %p501_p4 = pnand %p500_p3, %p494_p0 }
   0xa   :  { %504 = shalt.err (!%p501_p4)
}
   0xb   :  { %37 = dma.hbm_to_vmem [thread:$0]  %s629_s3, 256, %s35_s19, [#allocation5]  }
   0xc   :  { %s513_s25 = scalar_lea.vmem %s22_s21, 512  ;;  %p518_p6 = scmp.lt.s32.totalorder %s22_s21, %s22_s21 }
   0xd   :  { %p514_p5 = scmp.ne.s32.totalorder %s22_s21, %s513_s25  ;;  %p519_p7 = scmp.lt.s32.totalorder %s513_s25, %s513_s25 }
   0xf   :  { %p520_p8 = por %p519_p7, %p518_p6 }
  0x11   :  { %p521_p9 = pnand %p520_p8, %p514_p5 }
  0x13   :  { %524 = shalt.err (!%p521_p9)
}
  0x14   :  { %s551_s26 = smov 256   ;;  %s552_s27 = smov 16  }
  0x15   :  { %27 = dma.hbm_to_vmem [thread:$0]  %s628_s2, 512, %s22_s21, [#allocation3], %s551_s26, %s551_s26, %s552_s27  }
  0x16   :  { %s553_s30 = smov [#allocation6]  }
  0x17   :  { %s44_s6 = sshll.u32 %s553_s30, 4  ;;  %s45_s6 = int_to_ptr.vmem [resolvable:$true] %s44_s6 }
  0x18   :  { %s533_s7 = scalar_lea.vmem %s45_s6, 64  ;;  %p538_p11 = scmp.lt.s32.totalorder %s45_s6, %s45_s6 }
  0x19   :  { %p534_p10 = scmp.ne.s32.totalorder %s45_s6, %s533_s7  ;;  %p539_p12 = scmp.lt.s32.totalorder %s533_s7, %s533_s7 }
  0x1b   :  { %p540_p13 = por %p539_p12, %p538_p11 }
  0x1d   :  { %p541_p0 = pnand %p540_p13, %p534_p10 }
  0x1f   :  { %544 = shalt.err (!%p541_p0)
}
  0x20   :  { %47 = dma.hbm_to_vmem [thread:$0]  %s630_s4, 64, %s45_s6, [#allocation5]  }
  0x21   :  { %545 = dma.done.wait [#allocation3], 512  }
  0x22   :  { %546 = vsyncadd [#allocation3], 4294966784 }
  0x23   :  { %547 = dma.done.wait [#allocation5], 320  }
  0x24   :  { %548 = vsyncadd [#allocation5], 4294966976  ;;  %v554_v0 = vmov 0   ;;  %v71_v1 = vld [vmem:[#allocation4] sm:$0xff]  ;;  %vm87_vm0 = vcmask 1043456   ;;  %v72_v2 = vld [vmem:[#allocation4 + $0x8] sm:$0xff]  ;;  %v290_v18 = vlaneseq }
  0x25   :  { %132 = vmatprep.mubr.bf16.mxu0 %v554_v0  ;;  %173 = vmatprep.mubr.bf16.mxu1 %v554_v0  ;;  %v65_v3 = vld [vmem:[%s627_s1] sm:$0xff]  ;;  %v452_v4 = vcombine.high %v71_v1, %v71_v1  ;;  %v454_v5 = vcombine.high %v72_v2, %v72_v2  ;;  %v451_v6 = vcombine.low %v71_v1, %v71_v1  ;;  %v484_v12 = vld [vmem:[#allocation2 + $0xc] ss:$16 sps:$4 sm:$0xff]   ;;  %vm83_vm1 = vcmask 64512   ;;  %v482_v14 = vld [vmem:[#allocation2 + $0x8] ss:$16 sps:$4 sm:$0xff]  }
  0x26   :  { %v453_v7 = vcombine.low %v72_v2, %v72_v2  ;;  %v481_v8 = vld [vmem:[#allocation2 + $0x4] ss:$16 sps:$4 sm:$0xff]   ;;  %v66_v11 = vpack.c.bf16 %v65_v3, %v65_v3  ;;  %v479_v13 = vld [vmem:[#allocation2] ss:$16 sps:$4 sm:$0xff]   ;;  %vm202_vm2 = vcmask 130048   ;;  %v555_v17 = vmov 0.0  }
  0x27   :  { %455 = vmatprep.subr.msk.bf16.mxu0 %vm87_vm0, %v452_v4  ;;  %457 = vmatprep.subr.msk.bf16.mxu1 %vm87_vm0, %v454_v5  ;;  %v89_v9 = vsel %vm87_vm0, %v451_v6, 0  ;;  %v63_v15 = vld [vmem:[%s626_s0] sm:$0xff]  ;;  %62 = vst [vmem:[%s631_s5] sm:$0xff] %v555_v17  ;;  %v606_v19 = vshrl.u32 %v290_v18, 7  ;;  %v288_v28 = vld [vmem:[#allocation6] sm:$0xf]  ;;  %vm381_vm3 = vcmp.lt.s32.totalorder %v290_v18, 512 }
  0x28   :  { %v95_v10 = vsel %vm87_vm0, %v453_v7, 0  ;;  %115 = vmatpush1.bf16.msra.mxu0 %v89_v9  ;;  %v64_v16 = vpack.c.bf16 %v63_v15, %v63_v15  ;;  %v556_v39 = vmov 1966171168  }
  0x29   :  { %156 = vmatpush1.bf16.msra.mxu1 %v95_v10  ;;  %220 = vmatprep.subr.bf16.mxu0 %v481_v8  ;;  %v292_v24 = vsub.s32 0, %v606_v19  ;;  %v300_v25 = vsub.s32 2, %v606_v19  ;;  %v296_v31 = vsub.s32 1, %v606_v19  ;;  %v304_v32 = vsub.s32 3, %v606_v19 }
  0x2a   :  { %261 = vmatprep.subr.bf16.mxu1 %v484_v12  ;;  %v356_v40 = vunpack.c.l.s4 %v556_v39 }
  0x2b   :  { %456 = vmatmul.mubr.msk.bf16.vlgmr.msra.gmra.mxu0 %vm83_vm1, %v66_v11  ;;  %v293_v33 = vrot.slane %v288_v28, %v292_v24  ;;  %v301_v34 = vrot.slane %v288_v28, %v300_v25  ;;  %v297_v42 = vrot.slane %v288_v28, %v296_v31  ;;  %v305_v44 = vrot.slane %v288_v28, %v304_v32 }
  0x2c   :  { %458 = vmatmul.mubr.msk.bf16.vlgmr.msra.gmra.mxu1 %vm83_vm1, %v66_v11  ;;  %221 = vmatpush1.bf16.msra.mxu0 %v479_v13  ;;  %v357_v55 = vunpack.c.0.s8 %v356_v40 }
  0x2d   :  { %262 = vmatpush1.bf16.msra.mxu1 %v482_v14  ;;  %238 = vmatprep.mubr.bf16.mxu0 %v554_v0 }
  0x2e   :  { %279 = vmatprep.mubr.bf16.mxu1 %v554_v0 }
  0x33   :  { %463 = vmatmul.mubr.msk.bf16.vlgmr.msra.gmra.mxu0 %vm202_vm2, %v64_v16 }
  0x34   :  { %464 = vmatmul.mubr.msk.bf16.vlgmr.msra.gmra.mxu1 %vm202_vm2, %v64_v16 }
  0xeb   :  { %v134_v20 = vpop.f32.mrf.mxu0 }
  0xec   :  { %v175_v21 = vpop.f32.mrf.mxu1 }
  0xed   :  { %v136_v22 = vpop.f32.mrf.mxu0 }
  0xee   :  { %v177_v23 = vpop.f32.mrf.mxu1 }
  0xef   :  { %v138_v26 = vpop.f32.mrf.mxu0 }
  0xf0   :  { %v179_v27 = vpop.f32.mrf.mxu1 }
  0xf1   :  { %v139_v29 = vpop.f32.mrf.mxu0 }
  0xf2   :  { %v180_v30 = vpop.f32.mrf.mxu1 }
  0xf3   :  { %v240_v35 = vpop.f32.mrf.mxu0 }
  0xf4   :  { %v281_v36 = vpop.f32.mrf.mxu1  ;;  %v241_v37 = vadd.f32 %v240_v35, %v134_v20 }
  0xf5   :  { %v282_v38 = vadd.f32 %v281_v36, %v175_v21  ;;  %v242_v41 = vpop.f32.mrf.mxu0 }
  0xf6   :  { %v283_v43 = vpop.f32.mrf.mxu1  ;;  %v310_v45 = vadd.f32 %v293_v33, %v241_v37  ;;  %v243_v47 = vadd.f32 %v242_v41, %v136_v22  ;;  %v360_v37 = vsub.s32 %v357_v55, %v606_v19  ;;  %v324_v19 = vld [vmem:[%s631_s5] ss:$2 sm:$0xf] }
  0xf7   :  { %v312_v46 = vadd.f32 %v301_v34, %v282_v38  ;;  %v284_v48 = vadd.f32 %v283_v43, %v177_v23  ;;  %v244_v49 = vpop.f32.mrf.mxu0 }
  0xf8   :  { %v285_v50 = vpop.f32.mrf.mxu1  ;;  %v325_v51 = vrot.slane %v310_v45, 4  ;;  %v386_v52 = vmul.f32 %v310_v45, %v310_v45  ;;  %v311_v56 = vadd.f32 %v297_v42, %v243_v47 }
  0xf9   :  { %v337_v53 = vrot.slane %v312_v46, 4  ;;  %v388_v54 = vmul.f32 %v312_v46, %v312_v46  ;;  %v313_v57 = vadd.f32 %v305_v44, %v284_v48  ;;  %v245_v58 = vpop.f32.mrf.mxu0 }
  0xfa   :  { %v286_v59 = vpop.f32.mrf.mxu1  ;;  %v326_v60 = vadd.f32 %v325_v51, %v310_v45  ;;  %v390_v61 = vrot.slane %v386_v52, 4  ;;  %v331_v0 = vrot.slane %v311_v56, 4  ;;  %v387_v1 = vmul.f32 %v311_v56, %v311_v56  ;;  %v465_v58 = vld [vmem:[%s631_s5 + $0x1] ss:$2 sm:$0xf] }
  0xfb   :  { %v338_v62 = vadd.f32 %v337_v53, %v312_v46  ;;  %v402_v63 = vrot.slane %v388_v54, 4  ;;  %v343_v2 = vrot.slane %v313_v57, 4  ;;  %v389_v3 = vmul.f32 %v313_v57, %v313_v57 }
  0xfc   :  { %v327_v4 = vrot.slane %v326_v60, 2  ;;  %v391_v5 = vadd.f32 %v390_v61, %v386_v52  ;;  %v332_v8 = vadd.f32 %v331_v0, %v311_v56  ;;  %v396_v9 = vrot.slane %v387_v1, 4 }
  0xfd   :  { %v339_v6 = vrot.slane %v338_v62, 2  ;;  %v403_v7 = vadd.f32 %v402_v63, %v388_v54  ;;  %v344_v10 = vadd.f32 %v343_v2, %v313_v57  ;;  %v408_v11 = vrot.slane %v389_v3, 4 }
  0xfe   :  { %v328_v12 = vadd.f32 %v327_v4, %v326_v60  ;;  %v392_v13 = vrot.slane %v391_v5, 2  ;;  %v333_v16 = vrot.slane %v332_v8, 2  ;;  %v397_v17 = vadd.f32 %v396_v9, %v387_v1 }
  0xff   :  { %v340_v14 = vadd.f32 %v339_v6, %v338_v62  ;;  %v404_v15 = vrot.slane %v403_v7, 2  ;;  %v345_v20 = vrot.slane %v344_v10, 2  ;;  %v409_v21 = vadd.f32 %v408_v11, %v389_v3 }
 0x100   :  { %v329_v22 = vrot.slane %v328_v12, 1  ;;  %v393_v23 = vadd.f32 %v392_v13, %v391_v5  ;;  %v334_v26 = vadd.f32 %v333_v16, %v332_v8  ;;  %v398_v27 = vrot.slane %v397_v17, 2 }
 0x101   :  { %v341_v24 = vrot.slane %v340_v14, 1  ;;  %v405_v25 = vadd.f32 %v404_v15, %v403_v7  ;;  %v346_v28 = vadd.f32 %v345_v20, %v344_v10  ;;  %v410_v29 = vrot.slane %v409_v21, 2 }
 0x102   :  { %v394_v30 = vrot.slane %v393_v23, 1  ;;  %v335_v32 = vrot.slane %v334_v26, 1  ;;  %v399_v33 = vadd.f32 %v398_v27, %v397_v17  ;;  %v330_v36 = vadd.f32 %v329_v22, %v328_v12 }
 0x103   :  { %v406_v31 = vrot.slane %v405_v25, 1  ;;  %v347_v34 = vrot.slane %v346_v28, 1  ;;  %v411_v35 = vadd.f32 %v410_v29, %v409_v21  ;;  %v342_v38 = vadd.f32 %v341_v24, %v340_v14 }
 0x104   :  { %v336_v39 = vadd.f32 %v335_v32, %v334_v26  ;;  %v400_v40 = vrot.slane %v399_v33, 1  ;;  %v395_v43 = vadd.f32 %v394_v30, %v393_v23 }
 0x105   :  { %v348_v41 = vadd.f32 %v347_v34, %v346_v28  ;;  %v412_v42 = vrot.slane %v411_v35, 1  ;;  %v407_v44 = vadd.f32 %v406_v31, %v405_v25 }
 0x106   :  { %v353_v45 = vcombine.low %v330_v36, %v336_v39  ;;  %v401_v46 = vadd.f32 %v400_v40, %v399_v33 }
 0x107   :  { %v354_v47 = vcombine.low %v342_v38, %v348_v41  ;;  %v413_v48 = vadd.f32 %v412_v42, %v411_v35 }
 0x108   :  { %v361_v49 = vrot.slane %v353_v45, %v360_v37  ;;  %v418_v50 = vcombine.low %v395_v43, %v401_v46 }
 0x109   :  { %v368_v51 = vrot.slane %v354_v47, %v360_v37  ;;  %v419_v52 = vcombine.low %v407_v44, %v413_v48 }
 0x10a   :  { %v426_v53 = vrot.slane %v418_v50, %v360_v37 }
 0x10b   :  { %v369_v54 = vcombine.low %v361_v49, %v368_v51  ;;  %v433_v56 = vrot.slane %v419_v52, %v360_v37 }
 0x10d   :  { %v376_v55 = vrot.slane %v369_v54, %v360_v37  ;;  %v434_v57 = vcombine.low %v426_v53, %v433_v56 }
 0x10f   :  { %v378_v59 = vadd.f32 %v376_v55, %v324_v19  ;;  %v441_v60 = vrot.slane %v434_v57, %v360_v37 }
 0x111   :  { %383 = vst.msk [vmem:[%s631_s5] ss:$2 sm:$0xf] %vm381_vm3, %v378_v59  ;;  %v443_v61 = vadd.f32 %v465_v58, %v441_v60 }
 0x113   :  { %466 = vst.msk [vmem:[%s631_s5 + $0x1] ss:$2 sm:$0xf] %vm381_vm3, %v443_v61 }
 0x114   :  { %449 = vsyncpa [#allocation3], 1 }
 0x115   :  { %450 = vsyncpa [#allocation5], 1 }

// kernel: critic_forward.3
= control target key start
LH: loop header
LB: loop body
LE: loop exit
PB: predicated region body
PF: predicated region fallthrough
CT: control target
= control target key end

     0   :  { %s1687_s0 = inlined_call_operand.vmem [shape: f32[8,16], index: 0, kind: input, shape index: {}]   ;;  %s1688_s1 = inlined_call_operand.vmem [shape: f32[8,8], index: 1, kind: input, shape index: {}]   ;;  %s1689_s2 = inlined_call_operand.vmem [shape: bf16[16,512], index: 2, kind: input, shape index: {}]   ;;  %s1690_s3 = inlined_call_operand.vmem [shape: bf16[8,512], index: 3, kind: input, shape index: {}]   ;;  %s1691_s4 = inlined_call_operand.vmem [shape: f32[1,512], index: 4, kind: input, shape index: {}]   ;;  %s1692_s5 = inlined_call_operand.vmem [shape: f32[1,512], index: 5, kind: input, shape index: {}]   ;;  %s1693_s6 = inlined_call_operand.vmem [shape: f32[1,512], index: 6, kind: input, shape index: {}]   ;;  %s1694_s7 = inlined_call_operand.hbm [shape: bf16[512,384], index: 7, kind: input, shape index: {}]   ;;  %s1695_s8 = inlined_call_operand.vmem [shape: f32[1,384], index: 8, kind: input, shape index: {}]   ;;  %s1696_s9 = inlined_call_operand.vmem [shape: f32[1,384], index: 9, kind: input, shape index: {}]   ;;  %s1697_s10 = inlined_call_operand.<no memory space> [shape: f32[1,1], index: 10, kind: input, shape index: {}]   ;;  %s1698_s11 = inlined_call_operand.vmem [shape: f32[8,1], index: 11, kind: output, shape index: {}]  }
   0x1   :  { %v16_v0 = vstv %s1697_s10 }
   0x2   :  { %17 = vst [vmem:[#allocation2] sm:$0x1] %v16_v0 }
   0x3   :  { %18 = vsyncpa [#allocation4], 0  ;;  %s1546_s19 = smov [#allocation3]  }
   0x4   :  { %s38_s20 = sshll.u32 %s1546_s19, 4  ;;  %s39_s20 = int_to_ptr.vmem [resolvable:$true] %s38_s20 }
   0x5   :  { %s1532_s21 = scalar_lea.vmem %s39_s20, 12288  ;;  %p1537_p1 = scmp.lt.s32.totalorder %s39_s20, %s39_s20 }
   0x6   :  { %p1533_p0 = scmp.ne.s32.totalorder %s39_s20, %s1532_s21  ;;  %p1538_p2 = scmp.lt.s32.totalorder %s1532_s21, %s1532_s21 }
   0x8   :  { %p1539_p3 = por %p1538_p2, %p1537_p1 }
   0xa   :  { %p1540_p4 = pnand %p1539_p3, %p1533_p0 }
   0xc   :  { %1543 = shalt.err (!%p1540_p4)
}
   0xd   :  { %s1547_s22 = smov 192   ;;  %s1548_s23 = smov 12  }
   0xe   :  { %44 = dma.hbm_to_vmem [thread:$0]  %s1694_s7, 12288, %s39_s20, [#allocation4], %s1547_s22, %s1547_s22, %s1548_s23  }
   0xf   :  { %1544 = dma.done.wait [#allocation4], 12288  }
  0x10   :  { %1545 = vsyncadd [#allocation4], 4294955008  ;;  %v1549_v1 = vmov 0   ;;  %v63_v2 = vld [vmem:[%s1690_s3] sm:$0xff]  ;;  %vm79_vm0 = vcmask 1043456   ;;  %v64_v3 = vld [vmem:[%s1690_s3 + $0x8] sm:$0xff] }
  0x11   :  { %124 = vmatprep.mubr.bf16.mxu0 %v1549_v1  ;;  %165 = vmatprep.mubr.bf16.mxu1 %v1549_v1  ;;  %v57_v4 = vld [vmem:[%s1688_s1] sm:$0xff]  ;;  %v1228_v5 = vcombine.high %v63_v2, %v63_v2  ;;  %v1230_v6 = vcombine.high %v64_v3, %v64_v3  ;;  %v1227_v7 = vcombine.low %v63_v2, %v63_v2  ;;  %v1395_v14 = vld [vmem:[%s1689_s2 + $0xc] ss:$16 sps:$4 sm:$0xff]   ;;  %vm75_vm1 = vcmask 64512   ;;  %v1393_v15 = vld [vmem:[%s1689_s2 + $0x8] ss:$16 sps:$4 sm:$0xff]  }
  0x12   :  { %v1229_v8 = vcombine.low %v64_v3, %v64_v3  ;;  %v1392_v9 = vld [vmem:[%s1689_s2 + $0x4] ss:$16 sps:$4 sm:$0xff]   ;;  %v58_v12 = vpack.c.bf16 %v57_v4, %v57_v4  ;;  %v1390_v13 = vld [vmem:[%s1689_s2] ss:$16 sps:$4 sm:$0xff]   ;;  %vm194_vm2 = vcmask 130048   ;;  %vm1220_vm3 = vcmask 7168  }
  0x13   :  { %1231 = vmatprep.subr.msk.bf16.mxu0 %vm79_vm0, %v1228_v5  ;;  %1233 = vmatprep.subr.msk.bf16.mxu1 %vm79_vm0, %v1230_v6  ;;  %v81_v10 = vsel %vm79_vm0, %v1227_v7, 0  ;;  %v1398_v16 = vld [vmem:[#allocation3 + $0xac] ss:$12 sps:$4 sm:$0xff]   ;;  %v55_v18 = vld [vmem:[%s1687_s0] sm:$0xff]  ;;  %v1396_v20 = vld [vmem:[#allocation3 + $0xa8] ss:$12 sps:$4 sm:$0xff]  }
  0x14   :  { %v87_v11 = vsel %vm79_vm0, %v1229_v8, 0  ;;  %107 = vmatpush1.bf16.msra.mxu0 %v81_v10  ;;  %v1401_v17 = vld [vmem:[#allocation3 + $0x22c] ss:$12 sps:$4 sm:$0xff]   ;;  %v56_v19 = vpack.c.bf16 %v55_v18, %v55_v18  ;;  %v1399_v21 = vld [vmem:[#allocation3 + $0x228] ss:$12 sps:$4 sm:$0xff]  }
  0x15   :  { %148 = vmatpush1.bf16.msra.mxu1 %v87_v11  ;;  %212 = vmatprep.subr.bf16.mxu0 %v1392_v9  ;;  %v1404_v22 = vld [vmem:[#allocation3 + $0x94] ss:$12 sps:$4 sm:$0xff]   ;;  %v1402_v24 = vld [vmem:[#allocation3 + $0x90] ss:$12 sps:$4 sm:$0xff]   ;;  %v1408_v28 = vld [vmem:[#allocation3 + $0x78] ss:$12 sps:$4 sm:$0xff]  }
  0x16   :  { %253 = vmatprep.subr.bf16.mxu1 %v1395_v14  ;;  %v1407_v23 = vld [vmem:[#allocation3 + $0x214] ss:$12 sps:$4 sm:$0xff]   ;;  %v1405_v25 = vld [vmem:[#allocation3 + $0x210] ss:$12 sps:$4 sm:$0xff]   ;;  %v1411_v29 = vld [vmem:[#allocation3 + $0x1f8] ss:$12 sps:$4 sm:$0xff]  }
  0x17   :  { %1232 = vmatmul.mubr.msk.bf16.vlgmr.msra.gmra.mxu0 %vm75_vm1, %v58_v12  ;;  %v1410_v26 = vld [vmem:[#allocation3 + $0x7c] ss:$12 sps:$4 sm:$0xff]   ;;  %v1416_v30 = vld [vmem:[#allocation3 + $0x64] ss:$12 sps:$4 sm:$0xff]   ;;  %v1414_v32 = vld [vmem:[#allocation3 + $0x60] ss:$12 sps:$4 sm:$0xff]  }
  0x18   :  { %1234 = vmatmul.mubr.msk.bf16.vlgmr.msra.gmra.mxu1 %vm75_vm1, %v58_v12  ;;  %213 = vmatpush1.bf16.msra.mxu0 %v1390_v13  ;;  %v1413_v27 = vld [vmem:[#allocation3 + $0x1fc] ss:$12 sps:$4 sm:$0xff]   ;;  %v1419_v31 = vld [vmem:[#allocation3 + $0x1e4] ss:$12 sps:$4 sm:$0xff]   ;;  %v1417_v33 = vld [vmem:[#allocation3 + $0x1e0] ss:$12 sps:$4 sm:$0xff]  }
  0x19   :  { %254 = vmatpush1.bf16.msra.mxu1 %v1393_v15  ;;  %230 = vmatprep.mubr.bf16.mxu0 %v1549_v1  ;;  %v1422_v34 = vld [vmem:[#allocation3 + $0x4c] ss:$12 sps:$4 sm:$0xff]   ;;  %v1420_v36 = vld [vmem:[#allocation3 + $0x48] ss:$12 sps:$4 sm:$0xff]   ;;  %v1426_v40 = vld [vmem:[#allocation3 + $0x30] ss:$12 sps:$4 sm:$0xff]  }
  0x1a   :  { %271 = vmatprep.mubr.bf16.mxu1 %v1549_v1  ;;  %1023 = vmatprep.subr.bf16.mxu0 %v1398_v16  ;;  %v1425_v35 = vld [vmem:[#allocation3 + $0x1cc] ss:$12 sps:$4 sm:$0xff]   ;;  %v1423_v37 = vld [vmem:[#allocation3 + $0x1c8] ss:$12 sps:$4 sm:$0xff]   ;;  %v1429_v41 = vld [vmem:[#allocation3 + $0x1b0] ss:$12 sps:$4 sm:$0xff]  }
  0x1b   :  { %1064 = vmatprep.subr.bf16.mxu1 %v1401_v17  ;;  %v1428_v38 = vld [vmem:[#allocation3 + $0x34] ss:$12 sps:$4 sm:$0xff]   ;;  %v1434_v42 = vld [vmem:[#allocation3 + $0x1c] ss:$12 sps:$4 sm:$0xff]   ;;  %v1432_v44 = vld [vmem:[#allocation3 + $0x18] ss:$12 sps:$4 sm:$0xff]  }
  0x1c   :  { %v1431_v39 = vld [vmem:[#allocation3 + $0x1b4] ss:$12 sps:$4 sm:$0xff]   ;;  %v1437_v43 = vld [vmem:[#allocation3 + $0x19c] ss:$12 sps:$4 sm:$0xff]   ;;  %v1435_v45 = vld [vmem:[#allocation3 + $0x198] ss:$12 sps:$4 sm:$0xff]  }
  0x1d   :  { %v1440_v46 = vld [vmem:[#allocation3 + $0x4] ss:$12 sps:$4 sm:$0xff]   ;;  %v1438_v48 = vld [vmem:[#allocation3] ss:$12 sps:$4 sm:$0xff]   ;;  %v1444_v52 = vld [vmem:[#allocation3 + $0x168] ss:$12 sps:$4 sm:$0xff]  }
  0x1e   :  { %v1443_v47 = vld [vmem:[#allocation3 + $0x184] ss:$12 sps:$4 sm:$0xff]   ;;  %v1441_v49 = vld [vmem:[#allocation3 + $0x180] ss:$12 sps:$4 sm:$0xff]   ;;  %v1447_v53 = vld [vmem:[#allocation3 + $0x2e8] ss:$12 sps:$4 sm:$0xff]  }
  0x1f   :  { %1239 = vmatmul.mubr.msk.bf16.vlgmr.msra.gmra.mxu0 %vm194_vm2, %v56_v19  ;;  %v1446_v50 = vld [vmem:[#allocation3 + $0x16c] ss:$12 sps:$4 sm:$0xff]   ;;  %v1452_v54 = vld [vmem:[#allocation3 + $0x154] ss:$12 sps:$4 sm:$0xff]   ;;  %v1450_v56 = vld [vmem:[#allocation3 + $0x150] ss:$12 sps:$4 sm:$0xff]  }
  0x20   :  { %1240 = vmatmul.mubr.msk.bf16.vlgmr.msra.gmra.mxu1 %vm194_vm2, %v56_v19  ;;  %1024 = vmatpush1.bf16.msra.mxu0 %v1396_v20  ;;  %v1449_v51 = vld [vmem:[#allocation3 + $0x2ec] ss:$12 sps:$4 sm:$0xff]   ;;  %v1455_v55 = vld [vmem:[#allocation3 + $0x2d4] ss:$12 sps:$4 sm:$0xff]   ;;  %v1453_v57 = vld [vmem:[#allocation3 + $0x2d0] ss:$12 sps:$4 sm:$0xff]   ;;  %v282_v20 = vlaneseq }
  0x21   :  { %1065 = vmatpush1.bf16.msra.mxu1 %v1399_v21  ;;  %1025 = vmatprep.subr.bf16.mxu0 %v1404_v22  ;;  %v1458_v58 = vld [vmem:[#allocation3 + $0x13c] ss:$12 sps:$4 sm:$0xff]   ;;  %v1456_v60 = vld [vmem:[#allocation3 + $0x138] ss:$12 sps:$4 sm:$0xff]   ;;  %v1462_v0 = vld [vmem:[#allocation3 + $0x120] ss:$12 sps:$4 sm:$0xff]  }
  0x22   :  { %1066 = vmatprep.subr.bf16.mxu1 %v1407_v23  ;;  %v1461_v59 = vld [vmem:[#allocation3 + $0x2bc] ss:$12 sps:$4 sm:$0xff]   ;;  %v1459_v61 = vld [vmem:[#allocation3 + $0x2b8] ss:$12 sps:$4 sm:$0xff]   ;;  %v1465_v1 = vld [vmem:[#allocation3 + $0x2a0] ss:$12 sps:$4 sm:$0xff]  }
  0x23   :  { %v1464_v62 = vld [vmem:[#allocation3 + $0x124] ss:$12 sps:$4 sm:$0xff]   ;;  %v1470_v2 = vld [vmem:[#allocation3 + $0x10c] ss:$12 sps:$4 sm:$0xff]   ;;  %v1468_v4 = vld [vmem:[#allocation3 + $0x108] ss:$12 sps:$4 sm:$0xff]  }
  0x24   :  { %1026 = vmatpush1.bf16.msra.mxu0 %v1402_v24  ;;  %v1467_v63 = vld [vmem:[#allocation3 + $0x2a4] ss:$12 sps:$4 sm:$0xff]   ;;  %v1473_v3 = vld [vmem:[#allocation3 + $0x28c] ss:$12 sps:$4 sm:$0xff]   ;;  %v1471_v5 = vld [vmem:[#allocation3 + $0x288] ss:$12 sps:$4 sm:$0xff]  }
  0x25   :  { %1067 = vmatpush1.bf16.msra.mxu1 %v1405_v25  ;;  %1027 = vmatprep.subr.bf16.mxu0 %v1410_v26  ;;  %v1476_v6 = vld [vmem:[#allocation3 + $0xf4] ss:$12 sps:$4 sm:$0xff]   ;;  %v1474_v8 = vld [vmem:[#allocation3 + $0xf0] ss:$12 sps:$4 sm:$0xff]   ;;  %v1480_v12 = vld [vmem:[#allocation3 + $0xd8] ss:$12 sps:$4 sm:$0xff]  }
  0x26   :  { %1068 = vmatprep.subr.bf16.mxu1 %v1413_v27  ;;  %v1479_v7 = vld [vmem:[#allocation3 + $0x274] ss:$12 sps:$4 sm:$0xff]   ;;  %v1477_v9 = vld [vmem:[#allocation3 + $0x270] ss:$12 sps:$4 sm:$0xff]   ;;  %v1483_v13 = vld [vmem:[#allocation3 + $0x258] ss:$12 sps:$4 sm:$0xff]  }
  0x27   :  { %v1482_v10 = vld [vmem:[#allocation3 + $0xdc] ss:$12 sps:$4 sm:$0xff]   ;;  %v1486_v14 = vld [vmem:[#allocation3 + $0xc0] ss:$12 sps:$4 sm:$0xff]   ;;  %v1488_v15 = vld [vmem:[#allocation3 + $0xc4] ss:$12 sps:$4 sm:$0xff]  }
  0x28   :  { %1028 = vmatpush1.bf16.msra.mxu0 %v1408_v28  ;;  %v1485_v11 = vld [vmem:[#allocation3 + $0x25c] ss:$12 sps:$4 sm:$0xff]   ;;  %v1489_v16 = vld [vmem:[#allocation3 + $0x240] ss:$12 sps:$4 sm:$0xff]   ;;  %v1491_v17 = vld [vmem:[#allocation3 + $0x244] ss:$12 sps:$4 sm:$0xff]  }
  0x29   :  { %1069 = vmatpush1.bf16.msra.mxu1 %v1411_v29  ;;  %1029 = vmatprep.subr.bf16.mxu0 %v1416_v30  ;;  %v1492_v18 = vld [vmem:[#allocation3 + $0x170] ss:$12 sps:$4 sm:$0xff]   ;;  %v283_v21 = vshrl.u32 %v282_v20, 7  ;;  %v1497_v20 = vld [vmem:[#allocation3 + $0x2d8] ss:$12 sps:$4 sm:$0xff]  }
  0x2a   :  { %1070 = vmatprep.subr.bf16.mxu1 %v1419_v31  ;;  %v1493_v19 = vld [vmem:[#allocation3 + $0x2f0] ss:$12 sps:$4 sm:$0xff]  }
  0x2b   :  { %v1640_v26 = vsub.s32 0, %v283_v21  ;;  %v1642_v27 = vsub.s32 2, %v283_v21  ;;  %v280_v30 = vld [vmem:[%s1691_s4] sm:$0xf] }
  0x2c   :  { %1030 = vmatpush1.bf16.msra.mxu0 %v1414_v32  ;;  %v306_v31 = vld [vmem:[%s1692_s5] sm:$0xf]  ;;  %v1650_v32 = vsub.s32 1, %v283_v21 }
  0x2d   :  { %1071 = vmatpush1.bf16.msra.mxu1 %v1417_v33  ;;  %1031 = vmatprep.subr.bf16.mxu0 %v1422_v34  ;;  %v296_v33 = vsub.s32 3, %v283_v21  ;;  %v1498_v21 = vld [vmem:[#allocation3 + $0x98] ss:$12 sps:$4 sm:$0xff]  }
  0x2e   :  { %1072 = vmatprep.subr.bf16.mxu1 %v1425_v35 }
  0x30   :  { %1032 = vmatpush1.bf16.msra.mxu0 %v1420_v36  ;;  %v285_v36 = vrot.slane %v280_v30, %v1640_v26 }
  0x31   :  { %1073 = vmatpush1.bf16.msra.mxu1 %v1423_v37  ;;  %1033 = vmatprep.subr.bf16.mxu0 %v1428_v38  ;;  %v332_v37 = vld [vmem:[%s1693_s6] sm:$0xf]  ;;  %v293_v38 = vrot.slane %v280_v30, %v1642_v27 }
  0x32   :  { %1074 = vmatprep.subr.bf16.mxu1 %v1431_v39 }
  0x34   :  { %1034 = vmatpush1.bf16.msra.mxu0 %v1426_v40  ;;  %v311_v40 = vrot.slane %v306_v31, %v1640_v26 }
  0x35   :  { %1075 = vmatpush1.bf16.msra.mxu1 %v1429_v41  ;;  %1035 = vmatprep.subr.bf16.mxu0 %v1434_v42  ;;  %v319_v42 = vrot.slane %v306_v31, %v1642_v27 }
  0x36   :  { %1076 = vmatprep.subr.bf16.mxu1 %v1437_v43 }
  0x38   :  { %1036 = vmatpush1.bf16.msra.mxu0 %v1432_v44 }
  0x39   :  { %1077 = vmatpush1.bf16.msra.mxu1 %v1435_v45  ;;  %1037 = vmatprep.subr.bf16.mxu0 %v1440_v46  ;;  %v289_v45 = vrot.slane %v280_v30, %v1650_v32  ;;  %v297_v46 = vrot.slane %v280_v30, %v296_v33  ;;  %v1505_v30 = vld [vmem:[#allocation3 + $0x2a8] ss:$12 sps:$4 sm:$0xff]  }
  0x3a   :  { %1078 = vmatprep.subr.bf16.mxu1 %v1443_v47  ;;  %v337_v47 = vrot.slane %v332_v37, %v1640_v26 }
  0x3c   :  { %1038 = vmatpush1.bf16.msra.mxu0 %v1438_v48  ;;  %v345_v48 = vrot.slane %v332_v37, %v1642_v27 }
  0x3d   :  { %1079 = vmatpush1.bf16.msra.mxu1 %v1441_v49  ;;  %1039 = vmatprep.subr.bf16.mxu0 %v1446_v50  ;;  %v315_v50 = vrot.slane %v306_v31, %v1650_v32 }
  0x3e   :  { %1080 = vmatprep.subr.bf16.mxu1 %v1449_v51 }
  0x40   :  { %1040 = vmatpush2.bf16.msra.mxu0 %v1444_v52  ;;  %v323_v52 = vrot.slane %v306_v31, %v296_v33  ;;  %v1506_v31 = vld [vmem:[#allocation3 + $0x68] ss:$12 sps:$4 sm:$0xff]  }
  0x41   :  { %1081 = vmatpush2.bf16.msra.mxu1 %v1447_v53  ;;  %1041 = vmatprep.subr.bf16.mxu0 %v1452_v54 }
  0x42   :  { %1082 = vmatprep.subr.bf16.mxu1 %v1455_v55 }
  0x44   :  { %1042 = vmatpush2.bf16.msra.mxu0 %v1450_v56 }
  0x45   :  { %1083 = vmatpush2.bf16.msra.mxu1 %v1453_v57  ;;  %1043 = vmatprep.subr.bf16.mxu0 %v1458_v58 }
  0x46   :  { %1084 = vmatprep.subr.bf16.mxu1 %v1461_v59  ;;  %v341_v59 = vrot.slane %v332_v37, %v1650_v32 }
  0x48   :  { %1044 = vmatpush2.bf16.msra.mxu0 %v1456_v60  ;;  %v349_v60 = vrot.slane %v332_v37, %v296_v33  ;;  %v1507_v33 = vld [vmem:[#allocation3 + $0x1e8] ss:$12 sps:$4 sm:$0xff]   ;;  %v1511_v37 = vld [vmem:[#allocation3 + $0x1d0] ss:$12 sps:$4 sm:$0xff]  }
  0x49   :  { %1085 = vmatpush2.bf16.msra.mxu1 %v1459_v61  ;;  %1045 = vmatprep.subr.bf16.mxu0 %v1464_v62 }
  0x4a   :  { %1086 = vmatprep.subr.bf16.mxu1 %v1467_v63 }
  0x4c   :  { %1046 = vmatpush2.bf16.msra.mxu0 %v1462_v0 }
  0x4d   :  { %1087 = vmatpush2.bf16.msra.mxu1 %v1465_v1  ;;  %1047 = vmatprep.subr.bf16.mxu0 %v1470_v2 }
  0x4e   :  { %1088 = vmatprep.subr.bf16.mxu1 %v1473_v3 }
  0x50   :  { %1048 = vmatpush2.bf16.msra.mxu0 %v1468_v4 }
  0x51   :  { %1089 = vmatpush2.bf16.msra.mxu1 %v1471_v5  ;;  %1049 = vmatprep.subr.bf16.mxu0 %v1476_v6 }
  0x52   :  { %1090 = vmatprep.subr.bf16.mxu1 %v1479_v7 }
  0x54   :  { %1050 = vmatpush2.bf16.msra.mxu0 %v1474_v8 }
  0x55   :  { %1091 = vmatpush2.bf16.msra.mxu1 %v1477_v9  ;;  %1051 = vmatprep.subr.bf16.mxu0 %v1482_v10 }
  0x56   :  { %1092 = vmatprep.subr.bf16.mxu1 %v1485_v11 }
  0x58   :  { %1052 = vmatpush2.bf16.msra.mxu0 %v1480_v12 }
  0x59   :  { %1093 = vmatpush2.bf16.msra.mxu1 %v1483_v13  ;;  %1053 = vmatprep.subr.bf16.mxu0 %v1488_v15  ;;  %v1494_v15 = vld [vmem:[#allocation3 + $0xb0] ss:$12 sps:$4 sm:$0xff]  }
  0x5a   :  { %1094 = vmatprep.subr.bf16.mxu1 %v1491_v17 }
  0x5c   :  { %1054 = vmatpush2.bf16.msra.mxu0 %v1486_v14 }
  0x5d   :  { %1095 = vmatpush2.bf16.msra.mxu1 %v1489_v16  ;;  %1338 = vmatprep.subr.bf16.mxu0 %v1492_v18  ;;  %v1495_v16 = vld [vmem:[#allocation3 + $0x230] ss:$12 sps:$4 sm:$0xff]  }
  0x5e   :  { %1360 = vmatprep.subr.bf16.mxu1 %v1493_v19  ;;  %v1496_v19 = vld [vmem:[#allocation3 + $0x158] ss:$12 sps:$4 sm:$0xff]  }
  0xd7   :  { %v126_v22 = vpop.f32.mrf.mxu0 }
  0xd8   :  { %v167_v23 = vpop.f32.mrf.mxu1 }
  0xd9   :  { %v128_v24 = vpop.f32.mrf.mxu0 }
  0xda   :  { %v169_v25 = vpop.f32.mrf.mxu1 }
  0xdb   :  { %v130_v28 = vpop.f32.mrf.mxu0 }
  0xdc   :  { %v171_v29 = vpop.f32.mrf.mxu1  ;;  %v1503_v28 = vld [vmem:[#allocation3 + $0x200] ss:$12 sps:$4 sm:$0xff]  }
  0xdd   :  { %v131_v34 = vpop.f32.mrf.mxu0  ;;  %v1504_v29 = vld [vmem:[#allocation3 + $0x128] ss:$12 sps:$4 sm:$0xff]  }
  0xde   :  { %v172_v35 = vpop.f32.mrf.mxu1  ;;  %v1508_v34 = vld [vmem:[#allocation3 + $0x110] ss:$12 sps:$4 sm:$0xff]  }
  0xdf   :  { %v232_v39 = vpop.f32.mrf.mxu0  ;;  %v1509_v35 = vld [vmem:[#allocation3 + $0x290] ss:$12 sps:$4 sm:$0xff]  }
  0xe0   :  { %v273_v41 = vpop.f32.mrf.mxu1  ;;  %v233_v43 = vadd.f32 %v232_v39, %v126_v22  ;;  %v1499_v22 = vld [vmem:[#allocation3 + $0x218] ss:$12 sps:$4 sm:$0xff]  }
  0xe1   :  { %v274_v44 = vadd.f32 %v273_v41, %v167_v23  ;;  %v234_v49 = vpop.f32.mrf.mxu0  ;;  %v1500_v23 = vld [vmem:[#allocation3 + $0x140] ss:$12 sps:$4 sm:$0xff]   ;;  %v1513_v39 = vld [vmem:[#allocation3 + $0x278] ss:$12 sps:$4 sm:$0xff]  }
  0xe2   :  { %v275_v51 = vpop.f32.mrf.mxu1  ;;  %v302_v53 = vadd.f32 %v285_v36, %v233_v43  ;;  %v235_v55 = vadd.f32 %v234_v49, %v128_v24  ;;  %v1501_v24 = vld [vmem:[#allocation3 + $0x2c0] ss:$12 sps:$4 sm:$0xff]   ;;  %v1510_v36 = vld [vmem:[#allocation3 + $0x50] ss:$12 sps:$4 sm:$0xff]   ;;  %v1515_v41 = vld [vmem:[#allocation3 + $0x1b8] ss:$12 sps:$4 sm:$0xff]  }
  0xe3   :  { %v304_v54 = vadd.f32 %v293_v38, %v274_v44  ;;  %v276_v56 = vadd.f32 %v275_v51, %v169_v25  ;;  %v236_v57 = vpop.f32.mrf.mxu0  ;;  %v1502_v25 = vld [vmem:[#allocation3 + $0x80] ss:$12 sps:$4 sm:$0xff]   ;;  %v1512_v38 = vld [vmem:[#allocation3 + $0xf8] ss:$12 sps:$4 sm:$0xff]   ;;  %v1523_v49 = vld [vmem:[#allocation3 + $0x188] ss:$12 sps:$4 sm:$0xff]  }
  0xe4   :  { %v277_v58 = vpop.f32.mrf.mxu1  ;;  %v328_v61 = vmul.f32 %v311_v40, %v302_v53  ;;  %v303_v63 = vadd.f32 %v289_v45, %v235_v55  ;;  %v1514_v40 = vld [vmem:[#allocation3 + $0x38] ss:$12 sps:$4 sm:$0xff]   ;;  %v1517_v43 = vld [vmem:[#allocation3 + $0x260] ss:$12 sps:$4 sm:$0xff]  }
  0xe5   :  { %v330_v62 = vmul.f32 %v319_v42, %v304_v54  ;;  %v305_v0 = vadd.f32 %v297_v46, %v276_v56  ;;  %v237_v1 = vpop.f32.mrf.mxu0  ;;  %v1516_v42 = vld [vmem:[#allocation3 + $0xe0] ss:$12 sps:$4 sm:$0xff]   ;;  %v1520_v46 = vld [vmem:[#allocation3 + $0xc8] ss:$12 sps:$4 sm:$0xff]  }
  0xe6   :  { %v278_v2 = vpop.f32.mrf.mxu1  ;;  %v354_v3 = vadd.f32 %v337_v47, %v328_v61  ;;  %v329_v5 = vmul.f32 %v315_v50, %v303_v63  ;;  %v1518_v44 = vld [vmem:[#allocation3 + $0x20] ss:$12 sps:$4 sm:$0xff]   ;;  %v1521_v47 = vld [vmem:[#allocation3 + $0x248] ss:$12 sps:$4 sm:$0xff]  }
  0xe7   :  { %v356_v4 = vadd.f32 %v345_v48, %v330_v62  ;;  %v331_v6 = vmul.f32 %v323_v52, %v305_v0  ;;  %v1519_v45 = vld [vmem:[#allocation3 + $0x1a0] ss:$12 sps:$4 sm:$0xff]   ;;  %v1522_v48 = vld [vmem:[#allocation3 + $0x8] ss:$12 sps:$4 sm:$0xff]  }
  0xe8   :  { %v355_v7 = vadd.f32 %v341_v59, %v329_v5  ;;  %v358_v9 = vmax.f32 %v354_v3, 0.0  ;;  %v494_v58 = vld [vmem:[%s1695_s8] sm:$0x7] }
  0xe9   :  { %v357_v8 = vadd.f32 %v349_v60, %v331_v6  ;;  %v360_v10 = vmax.f32 %v356_v4, 0.0  ;;  %v503_v59 = vrot.slane %v494_v58, %v1650_v32  ;;  %v499_v60 = vrot.slane %v494_v58, %v1640_v26  ;;  %v1188_v4 = vld [vmem:[%s1696_s9] sm:$0x7] }
  0xea   :  { %v359_v11 = vmax.f32 %v355_v7, 0.0  ;;  %v1664_v17 = vpack.c.bf16 %v358_v9, %v358_v9  ;;  %v507_v3 = vrot.slane %v494_v58, %v1642_v27 }
  0xeb   :  { %v361_v12 = vmax.f32 %v357_v8, 0.0  ;;  %v1666_v18 = vpack.c.bf16 %v360_v10, %v360_v10  ;;  %v1197_v8 = vrot.slane %v1188_v4, %v1650_v32  ;;  %v1337_v32 = vld [vmem:[#allocation2] ss:$0 sm:$0xff] }
  0xec   :  { %v363_v13 = vpack.c.bf16 %v359_v11, %v359_v11 }
  0xed   :  { %v365_v14 = vpack.c.bf16 %v361_v12, %v361_v12 }
  0xee   :  { %1055 = vmatprep.mubr.bf16.mxu0 %v363_v13 }
  0xef   :  { %1096 = vmatprep.mubr.bf16.mxu1 %v365_v14  ;;  %1056 = vmatmul.mubr.bf16.vlgmr.msra.gmra.mxu0 %v1664_v17 }
  0xf0   :  { %1097 = vmatmul.mubr.bf16.vlgmr.msra.gmra.mxu1 %v1666_v18  ;;  %1339 = vmatpush3.bf16.msra.mxu0 %v1494_v15 }
  0xf1   :  { %1361 = vmatpush3.bf16.msra.mxu1 %v1495_v16  ;;  %1137 = vmatprep.mubr.bf16.mxu0 %v363_v13  ;;  %v1193_v13 = vrot.slane %v1188_v4, %v1640_v26 }
  0xf2   :  { %1177 = vmatprep.mubr.bf16.mxu1 %v365_v14  ;;  %1340 = vmatprep.subr.bf16.mxu0 %v1496_v19 }
  0xf3   :  { %1362 = vmatprep.subr.bf16.mxu1 %v1497_v20  ;;  %v1201_v20 = vrot.slane %v1188_v4, %v1642_v27 }
  0xf4   :  { %1341 = vmatpush3.bf16.msra.mxu0 %v1498_v21 }
  0xf5   :  { %1363 = vmatpush3.bf16.msra.mxu1 %v1499_v22  ;;  %1342 = vmatprep.subr.bf16.mxu0 %v1500_v23 }
  0xf6   :  { %1364 = vmatprep.subr.bf16.mxu1 %v1501_v24 }
  0xf8   :  { %1343 = vmatpush3.bf16.msra.mxu0 %v1502_v25 }
  0xf9   :  { %1365 = vmatpush3.bf16.msra.mxu1 %v1503_v28  ;;  %1344 = vmatprep.subr.bf16.mxu0 %v1504_v29 }
  0xfa   :  { %1366 = vmatprep.subr.bf16.mxu1 %v1505_v30 }
  0xfc   :  { %1345 = vmatpush3.bf16.msra.mxu0 %v1506_v31 }
  0xfd   :  { %1367 = vmatpush3.bf16.msra.mxu1 %v1507_v33  ;;  %1346 = vmatprep.subr.bf16.mxu0 %v1508_v34 }
  0xfe   :  { %1368 = vmatprep.subr.bf16.mxu1 %v1509_v35 }
 0x100   :  { %1347 = vmatpush3.bf16.msra.mxu0 %v1510_v36 }
 0x101   :  { %1369 = vmatpush3.bf16.msra.mxu1 %v1511_v37  ;;  %1348 = vmatprep.subr.bf16.mxu0 %v1512_v38 }
 0x102   :  { %1370 = vmatprep.subr.bf16.mxu1 %v1513_v39 }
 0x104   :  { %1349 = vmatpush3.bf16.msra.mxu0 %v1514_v40 }
 0x105   :  { %1371 = vmatpush3.bf16.msra.mxu1 %v1515_v41  ;;  %1350 = vmatprep.subr.bf16.mxu0 %v1516_v42 }
 0x106   :  { %1372 = vmatprep.subr.bf16.mxu1 %v1517_v43 }
 0x108   :  { %1351 = vmatpush3.bf16.msra.mxu0 %v1518_v44 }
 0x109   :  { %1373 = vmatpush3.bf16.msra.mxu1 %v1519_v45  ;;  %1352 = vmatprep.subr.bf16.mxu0 %v1520_v46 }
 0x10a   :  { %1374 = vmatprep.subr.bf16.mxu1 %v1521_v47 }
 0x10c   :  { %1353 = vmatpush3.bf16.msra.mxu0 %v1522_v48 }
 0x10d   :  { %1375 = vmatpush3.bf16.msra.mxu1 %v1523_v49 }
 0x10f   :  { %1138 = vmatmul.mubr.bf16.vlgmr.msra.gmra.mxu0 %v1664_v17 }
 0x110   :  { %1178 = vmatmul.mubr.bf16.vlgmr.msra.gmra.mxu1 %v1666_v18 }
 0x1af   :  { %v1057_v50 = vpop.f32.mrf.mxu0 }
 0x1b0   :  { %v1098_v51 = vpop.f32.mrf.mxu1  ;;  %v1058_v62 = vadd.f32 %v1057_v50, %v499_v60 }
 0x1b1   :  { %v1059_v52 = vpop.f32.mrf.mxu0 }
 0x1b2   :  { %v1100_v53 = vpop.f32.mrf.mxu1  ;;  %v1060_v61 = vadd.f32 %v1059_v52, %v503_v59  ;;  %v1099_v2 = vadd.f32 %v1098_v51, %v1058_v62 }
 0x1b3   :  { %v1061_v54 = vpop.f32.mrf.mxu0 }
 0x1b4   :  { %v1102_v55 = vpop.f32.mrf.mxu1  ;;  %v1101_v63 = vadd.f32 %v1100_v53, %v1060_v61  ;;  %v1185_v12 = vmax.f32 %v1099_v2, 0.0 }
 0x1b5   :  { %v1062_v56 = vpop.f32.mrf.mxu0 }
 0x1b6   :  { %v1103_v57 = vpop.f32.mrf.mxu1  ;;  %v1186_v7 = vmax.f32 %v1101_v63, 0.0  ;;  %v1205_v21 = vmul.f32 %v1193_v13, %v1185_v12 }
 0x1b8   :  { %v1206_v18 = vmul.f32 %v1197_v8, %v1186_v7 }
 0x1ba   :  { %v1208_v24 = vadd.f32 %v1206_v18, %v1205_v21 }
 0x1cf   :  { %v1354_v0 = vpop.f32.mrf.mxu0 }
 0x1d0   :  { %v1376_v1 = vpop.f32.mrf.mxu1 }
 0x1d1   :  { %v1355_v5 = vpop.f32.mrf.mxu0 }
 0x1d2   :  { %v1377_v6 = vpop.f32.mrf.mxu1  ;;  %v1356_v9 = vadd.f32 %v1355_v5, %v1354_v0 }
 0x1d3   :  { %v1357_v10 = vpop.f32.mrf.mxu0  ;;  %v1378_v15 = vadd.f32 %v1377_v6, %v1376_v1 }
 0x1d4   :  { %v1379_v11 = vpop.f32.mrf.mxu1  ;;  %v1140_v14 = vadd.f32 %v1356_v9, %v507_v3 }
 0x1d5   :  { %v1358_v16 = vpop.f32.mrf.mxu0 }
 0x1d6   :  { %v1380_v17 = vpop.f32.mrf.mxu1  ;;  %v1180_v19 = vadd.f32 %v1378_v15, %v1140_v14 }
 0x1d8   :  { %v1187_v22 = vmax.f32 %v1180_v19, 0.0 }
 0x1da   :  { %v1207_v23 = vmul.f32 %v1201_v20, %v1187_v22 }
 0x1dc   :  { %v1209_v25 = vadd.f32 %v1208_v24, %v1207_v23 }
 0x1de   :  { %1210 = vadd.xlane.f32.xlu0 %v1209_v25 }
 0x267   :  { %v1211_v28 = vpop.xlane.xlu0 %1210 }
 0x268   :  { %v1219_v29 = vadd.f32 %v1337_v32, %v1211_v28 }
 0x26a   :  { %1221 = vst.msk [vmem:[%s1698_s11] sm:$0xff] %vm1220_vm3, %v1219_v29 }
 0x26b   :  { %1226 = vsyncpa [#allocation4], 1 }

</bundles_post_ra>
